<compile_context>
chip_gen: v5e
topology: v5e:2x2
jax: 0.10.0
libtpu: 0.0.40
codegen_flags: <defaults>
</compile_context>

<pallas_src>
import jax
import jax.numpy as jnp
from jax.experimental import pallas as pl
from jax.experimental.pallas import tpu as pltpu


def mlp_kernel(x_ref, w1_ref, b1_ref, w2_ref, b2_ref, w3_ref, b3_ref, o_ref):
    x = x_ref[...]                                   # (TM, K)  bf16
    # Hidden layer 1: Linear + ReLU (bf16 operands on the MXU, f32 accumulation).
    h1 = jnp.dot(x, w1_ref[...], preferred_element_type=jnp.float32)
    h1 = jnp.maximum(h1 + b1_ref[...], 0.0).astype(x.dtype)
    # Hidden layer 2: Linear + ReLU.
    h2 = jnp.dot(h1, w2_ref[...], preferred_element_type=jnp.float32)
    h2 = jnp.maximum(h2 + b2_ref[...], 0.0).astype(x.dtype)
    # Output layer: Linear (no activation); bias add folded into the store.
    out = jnp.dot(h2, w3_ref[...], preferred_element_type=jnp.float32)
    o_ref[...] = (out + b3_ref[...]).astype(o_ref.dtype)


def _round_up(n, m):
    return ((n + m - 1) // m) * m


def _maybe_pad2(a, rows, cols, dtype):
    """Pad a (possibly 1-D) array to (rows, cols); no-op copy when already aligned."""
    a = jnp.asarray(a)
    if a.ndim == 1:
        a = a[None, :]
    if a.shape == (rows, cols):
        return a.astype(dtype)
    out = jnp.zeros((rows, cols), dtype)
    return out.at[: a.shape[0], : a.shape[1]].set(a.astype(dtype))


def _device_kind():
    try:
        return jax.devices()[0].device_kind.lower()
    except Exception:
        return ""


def _vmem_budget_bytes():
    # Per-TensorCore VMEM capacity (64 MiB on v7x, 128 MiB on v5e/v6e); leave
    # ~1/8 headroom for compiler scratch.  Fall back to the smallest (v7x).
    cap = 64 * 1024 * 1024
    try:
        cap = int(pltpu.get_tpu_info().vmem_capacity_bytes)
    except Exception:
        pass
    return (cap * 7) // 8


def prepare_params(w1, b1, w2, b2, w3, b3, *, compute_dtype=jnp.bfloat16):
    """One-time padding (to lane multiples of 128) + cast of the MLP parameters.

    Call this OUTSIDE the per-step hot path; mlp_forward then incurs no weight
    padding / casting HBM traffic per forward call.
    """
    w1 = jnp.asarray(w1)
    w2 = jnp.asarray(w2)
    w3 = jnp.asarray(w3)
    input_size, hidden = w1.shape
    hidden2 = w2.shape[1]
    out_size = w3.shape[1]

    K = _round_up(input_size, 128)
    H1 = _round_up(hidden, 128)
    H2 = _round_up(hidden2, 128)
    O = _round_up(out_size, 128)

    # Zero padding is semantics-preserving: padded rows/cols contribute 0 to the
    # dots, padded bias lanes are 0, ReLU(0) = 0, and the wrapper slices off
    # the padded output lanes.
    return {
        "w1": _maybe_pad2(w1, K, H1, compute_dtype),
        "b1": _maybe_pad2(b1, 1, H1, jnp.float32),
        "w2": _maybe_pad2(w2, H1, H2, compute_dtype),
        "b2": _maybe_pad2(b2, 1, H2, jnp.float32),
        "w3": _maybe_pad2(w3, H2, O, compute_dtype),
        "b3": _maybe_pad2(b3, 1, O, jnp.float32),
        "dims": (int(input_size), int(hidden), int(hidden2), int(out_size)),
        "compute_dtype": compute_dtype,
    }


def mlp_forward(x, params, *, out_dtype=None, tm=None):
    compute_dtype = params["compute_dtype"]
    input_size, hidden, hidden2, out_size = params["dims"]
    w1p, b1p, w2p, b2p, w3p, b3p = (
        params[k] for k in ("w1", "b1", "w2", "b2", "w3", "b3")
    )
    K, H1 = w1p.shape
    H2 = w2p.shape[1]
    O = w3p.shape[1]

    batch = x.shape[0]
    assert x.shape[1] == input_size, "input feature size mismatch"
    out_dtype = compute_dtype if out_dtype is None else out_dtype

    x_item = jnp.dtype(compute_dtype).itemsize
    out_item = jnp.dtype(out_dtype).itemsize

    # --- VMEM accounting (per TensorCore) -------------------------------------
    resident_bytes = (K * H1 + H1 * H2 + H2 * O) * x_item + (H1 + H2 + O) * 4
    flops_per_row = 2 * (K * H1 + H1 * H2 + H2 * O)
    stream_bytes_per_row = K * x_item + O * out_item
    mem_bound = flops_per_row < 600 * stream_bytes_per_row  # below roofline knee
    x_bufs_for_sizing = 3 if mem_bound else 2
    # x buffers + double-buffered out tile + f32/bf16 intermediates per row.
    bytes_per_row = x_bufs_for_sizing * K * x_item + 2 * O * out_item + (H1 + H2) * 6

    budget = _vmem_budget_bytes()
    slack = 2 << 20
    if 2 * resident_bytes + 8 * bytes_per_row + slack > budget:
        # TODO(synk): add a hidden-dim-tiled accumulator path (second grid axis
        # over H/O chunks + f32 VMEM scratch with pl.when init/finalize) for
        # weight sets that do not fit resident in per-core VMEM (64 MiB on v7x).
        raise ValueError("MLP weights too large to keep resident in per-core VMEM")

    # --- Batch tile size (generation aware) ------------------------------------
    avail = budget - resident_bytes - slack
    tm_cap = max(8, (avail // bytes_per_row) // 8 * 8)
    if tm is None:
        # v5e's 128-wide MXU saturates around 256 rows; v6e/v7x want bigger tiles.
        tm = 256 if "v5" in _device_kind() else 512
    TM = int(min(tm, tm_cap))

    Bp = _round_up(batch, 8)
    if Bp <= TM:
        if Bp >= 16:
            # >= 2 tiles so the "parallel" batch axis can shard across v7x's 2 TCs.
            TM = _round_up((Bp + 1) // 2, 8)
            Bp = 2 * TM
        else:
            TM = Bp
    else:
        Bp = _round_up(batch, TM)
    n_tiles = Bp // TM
    grid = (n_tiles,)
    x_bufs = 3 if (mem_bound and n_tiles >= 3) else 2

    # --- x: pad only what is needed (batch remainder / feature lanes) ----------
    xc = x.astype(compute_dtype)
    if xc.shape != (Bp, K):
        xc = jnp.pad(xc, ((0, Bp - batch), (0, K - input_size)))

    cost = pl.CostEstimate(
        flops=2 * Bp * (K * H1 + H1 * H2 + H2 * O),
        transcendentals=0,
        bytes_accessed=Bp * K * x_item + resident_bytes + Bp * O * out_item,
    )
    compiler_params = pltpu.CompilerParams(
        dimension_semantics=("parallel",),
        vmem_limit_bytes=int(budget),
    )

    def _specs(use_pipeline_mode):
        res = {"pipeline_mode": pl.Buffered(1)} if use_pipeline_mode else {}
        xk = {"pipeline_mode": pl.Buffered(x_bufs)} if use_pipeline_mode else {}
        in_specs = [
            pl.BlockSpec((TM, K), lambda i: (i, 0), **xk),       # x tile (streamed)
            pl.BlockSpec((K, H1), lambda i: (0, 0), **res),      # W1 (resident)
            pl.BlockSpec((1, H1), lambda i: (0, 0), **res),      # b1 (resident)
            pl.BlockSpec((H1, H2), lambda i: (0, 0), **res),     # W2 (resident)
            pl.BlockSpec((1, H2), lambda i: (0, 0), **res),      # b2 (resident)
            pl.BlockSpec((H2, O), lambda i: (0, 0), **res),      # W3 (resident)
            pl.BlockSpec((1, O), lambda i: (0, 0), **res),       # b3 (resident)
        ]
        out_specs = pl.BlockSpec((TM, O), lambda i: (i, 0))
        return in_specs, out_specs

    def _call(use_pipeline_mode):
        in_specs, out_specs = _specs(use_pipeline_mode)
        return pl.pallas_call(
            mlp_kernel,
            out_shape=jax.ShapeDtypeStruct((Bp, O), out_dtype),
            grid=grid,
            in_specs=in_specs,
            out_specs=out_specs,
            compiler_params=compiler_params,
            cost_estimate=cost,
        )(xc, w1p, b1p, w2p, b2p, w3p, b3p)

    try:
        out_padded = _call(True)
    except Exception:
        # Defensive fallback: identical kernel/specs without pipeline_mode for
        # jax builds / backends that reject pl.Buffered on pallas_call specs.
        out_padded = _call(False)

    return out_padded[:batch, :out_size]


def init_params(key, input_size, hidden_size, hidden_size2, out_size):
    ks = jax.random.split(key, 6)

    # Deterministic synthetic init (uniform, roughly PyTorch-like scale).
    def lin(kw, kb, fan_in, fan_out):
        bound = 1.0 / jnp.sqrt(fan_in)
        w = jax.random.uniform(kw, (fan_in, fan_out), jnp.float32, -bound, bound)
        b = jax.random.uniform(kb, (1, fan_out), jnp.float32, -bound, bound)
        return w, b

    w1, b1 = lin(ks[0], ks[1], input_size, hidden_size)
    w2, b2 = lin(ks[2], ks[3], hidden_size, hidden_size2)
    w3, b3 = lin(ks[4], ks[5], hidden_size2, out_size)
    return w1, b1, w2, b2, w3, b3


if __name__ == "__main__":
    key = jax.random.PRNGKey(0)
    k_x, k_p = jax.random.split(key)

    # Small shapes consistent with the MLP forward: (batch, input_size)
    batch, input_size, hidden_size, hidden_size2, out_size = 8, 16, 32, 32, 4

    x = jax.random.normal(k_x, (batch, input_size), jnp.float32)
    w1, b1, w2, b2, w3, b3 = init_params(
        k_p, input_size, hidden_size, hidden_size2, out_size
    )

    # One-time parameter preparation (padding / casting happens here, NOT per call).
    params = prepare_params(w1, b1, w2, b2, w3, b3)

    out = mlp_forward(x, params)
    out = jax.block_until_ready(out)

    # Pure-JAX reference matching the kernel's bf16-operand / f32-accumulate /
    # bf16-output path.
    bf = lambda a: a.astype(jnp.bfloat16).astype(jnp.float32)
    h1 = jnp.maximum(bf(x) @ bf(w1) + b1, 0.0)
    h2 = jnp.maximum(bf(h1) @ bf(w2) + b2, 0.0)
    ref = bf(h2) @ bf(w3) + b3
    ref = ref.astype(jnp.bfloat16).astype(jnp.float32)

    assert out.shape == (batch, out_size)
    assert jnp.allclose(out.astype(jnp.float32), ref, atol=2e-2, rtol=2e-2)

    print("KERNEL_OK")
</pallas_src>

<mosaic_0001>
module attributes {stable_mosaic.version = 11 : i64} {
  func.func @mlp_kernel(%arg0: i32, %arg1: memref<8x128xbf16, #tpu.memory_space<vmem>>, %arg2: memref<128x128xbf16, #tpu.memory_space<vmem>>, %arg3: memref<1x128xf32, #tpu.memory_space<vmem>>, %arg4: memref<128x128xbf16, #tpu.memory_space<vmem>>, %arg5: memref<1x128xf32, #tpu.memory_space<vmem>>, %arg6: memref<128x128xbf16, #tpu.memory_space<vmem>>, %arg7: memref<1x128xf32, #tpu.memory_space<vmem>>, %arg8: memref<8x128xbf16, #tpu.memory_space<vmem>>) attributes {dimension_semantics = [#tpu.dimension_semantics<parallel>], iteration_bounds = array<i64: 1>, scalar_prefetch = 0 : i64, scratch_operands = 0 : i64, tpu.core_type = #tpu.core_type<tc>, window_params = [{pipeline_mode = #tpu.pipeline_mode<double_buffered>, transform_indices = @transform_0, window_bounds = array<i64: 8, 128>}, {pipeline_mode = #tpu.pipeline_mode<synchronous>, transform_indices = @transform_1, window_bounds = array<i64: 128, 128>}, {pipeline_mode = #tpu.pipeline_mode<synchronous>, transform_indices = @transform_2, window_bounds = array<i64: 1, 128>}, {pipeline_mode = #tpu.pipeline_mode<synchronous>, transform_indices = @transform_3, window_bounds = array<i64: 128, 128>}, {pipeline_mode = #tpu.pipeline_mode<synchronous>, transform_indices = @transform_4, window_bounds = array<i64: 1, 128>}, {pipeline_mode = #tpu.pipeline_mode<synchronous>, transform_indices = @transform_5, window_bounds = array<i64: 128, 128>}, {pipeline_mode = #tpu.pipeline_mode<synchronous>, transform_indices = @transform_6, window_bounds = array<i64: 1, 128>}, {transform_indices = @transform_7, window_bounds = array<i64: 8, 128>}]} {
    %c0 = arith.constant 0 : index
    %c0_0 = arith.constant 0 : index
    %0 = vector.load %arg1[%c0, %c0_0] : memref<8x128xbf16, #tpu.memory_space<vmem>>, vector<8x128xbf16>
    %c0_1 = arith.constant 0 : index
    %c0_2 = arith.constant 0 : index
    %1 = vector.load %arg2[%c0_1, %c0_2] : memref<128x128xbf16, #tpu.memory_space<vmem>>, vector<128x128xbf16>
    %cst = arith.constant dense<0.000000e+00> : vector<8x128xf32>
    %2 = tpu.matmul %0, %1, %cst {dimension_numbers = #tpu.dot_dimension_numbers<[1], [0], [0], [1], [0, 0, 1, 1], [], []>} : vector<8x128xbf16>, vector<128x128xbf16>, vector<8x128xf32> -> vector<8x128xf32>
    %c0_3 = arith.constant 0 : index
    %c0_4 = arith.constant 0 : index
    %3 = vector.load %arg3[%c0_3, %c0_4] : memref<1x128xf32, #tpu.memory_space<vmem>>, vector<1x128xf32>
    %4 = vector.broadcast %3 : vector<1x128xf32> to vector<8x128xf32>
    %5 = arith.addf %2, %4 : vector<8x128xf32>
    %cst_5 = arith.constant 0.000000e+00 : f32
    %6 = vector.broadcast %cst_5 : f32 to vector<8x128xf32>
    %7 = arith.maximumf %5, %6 : vector<8x128xf32>
    %8 = arith.truncf %7 : vector<8x128xf32> to vector<8x128xbf16>
    %c0_6 = arith.constant 0 : index
    %c0_7 = arith.constant 0 : index
    %9 = vector.load %arg4[%c0_6, %c0_7] : memref<128x128xbf16, #tpu.memory_space<vmem>>, vector<128x128xbf16>
    %cst_8 = arith.constant dense<0.000000e+00> : vector<8x128xf32>
    %10 = tpu.matmul %8, %9, %cst_8 {dimension_numbers = #tpu.dot_dimension_numbers<[1], [0], [0], [1], [0, 0, 1, 1], [], []>} : vector<8x128xbf16>, vector<128x128xbf16>, vector<8x128xf32> -> vector<8x128xf32>
    %c0_9 = arith.constant 0 : index
    %c0_10 = arith.constant 0 : index
    %11 = vector.load %arg5[%c0_9, %c0_10] : memref<1x128xf32, #tpu.memory_space<vmem>>, vector<1x128xf32>
    %12 = vector.broadcast %11 : vector<1x128xf32> to vector<8x128xf32>
    %13 = arith.addf %10, %12 : vector<8x128xf32>
    %cst_11 = arith.constant 0.000000e+00 : f32
    %14 = vector.broadcast %cst_11 : f32 to vector<8x128xf32>
    %15 = arith.maximumf %13, %14 : vector<8x128xf32>
    %16 = arith.truncf %15 : vector<8x128xf32> to vector<8x128xbf16>
    %c0_12 = arith.constant 0 : index
    %c0_13 = arith.constant 0 : index
    %17 = vector.load %arg6[%c0_12, %c0_13] : memref<128x128xbf16, #tpu.memory_space<vmem>>, vector<128x128xbf16>
    %cst_14 = arith.constant dense<0.000000e+00> : vector<8x128xf32>
    %18 = tpu.matmul %16, %17, %cst_14 {dimension_numbers = #tpu.dot_dimension_numbers<[1], [0], [0], [1], [0, 0, 1, 1], [], []>} : vector<8x128xbf16>, vector<128x128xbf16>, vector<8x128xf32> -> vector<8x128xf32>
    %c0_15 = arith.constant 0 : index
    %c0_16 = arith.constant 0 : index
    %19 = vector.load %arg7[%c0_15, %c0_16] : memref<1x128xf32, #tpu.memory_space<vmem>>, vector<1x128xf32>
    %20 = vector.broadcast %19 : vector<1x128xf32> to vector<8x128xf32>
    %21 = arith.addf %18, %20 : vector<8x128xf32>
    %22 = arith.truncf %21 : vector<8x128xf32> to vector<8x128xbf16>
    %c0_17 = arith.constant 0 : index
    %c0_18 = arith.constant 0 : index
    %23 = vector.load %arg8[%c0_17, %c0_18] : memref<8x128xbf16, #tpu.memory_space<vmem>>, vector<8x128xbf16>
    tpu.vector_store %arg8[%c0_17, %c0_18], %22 {strides = array<i32>} : memref<8x128xbf16, #tpu.memory_space<vmem>>, vector<8x128xbf16>,
    return
  }
  func.func @transform_0(%arg0: i32) -> (i32, i32) {
    %c0_i32 = arith.constant 0 : i32
    %c0_i32_0 = arith.constant 0 : i32
    return %arg0, %c0_i32 : i32, i32
  }
  func.func @transform_1(%arg0: i32) -> (i32, i32) {
    %c0_i32 = arith.constant 0 : i32
    %c0_i32_0 = arith.constant 0 : i32
    %c0_i32_1 = arith.constant 0 : i32
    return %c0_i32, %c0_i32_0 : i32, i32
  }
  func.func @transform_2(%arg0: i32) -> (i32, i32) {
    %c0_i32 = arith.constant 0 : i32
    %c0_i32_0 = arith.constant 0 : i32
    %c0_i32_1 = arith.constant 0 : i32
    return %c0_i32, %c0_i32_0 : i32, i32
  }
  func.func @transform_3(%arg0: i32) -> (i32, i32) {
    %c0_i32 = arith.constant 0 : i32
    %c0_i32_0 = arith.constant 0 : i32
    %c0_i32_1 = arith.constant 0 : i32
    return %c0_i32, %c0_i32_0 : i32, i32
  }
  func.func @transform_4(%arg0: i32) -> (i32, i32) {
    %c0_i32 = arith.constant 0 : i32
    %c0_i32_0 = arith.constant 0 : i32
    %c0_i32_1 = arith.constant 0 : i32
    return %c0_i32, %c0_i32_0 : i32, i32
  }
  func.func @transform_5(%arg0: i32) -> (i32, i32) {
    %c0_i32 = arith.constant 0 : i32
    %c0_i32_0 = arith.constant 0 : i32
    %c0_i32_1 = arith.constant 0 : i32
    return %c0_i32, %c0_i32_0 : i32, i32
  }
  func.func @transform_6(%arg0: i32) -> (i32, i32) {
    %c0_i32 = arith.constant 0 : i32
    %c0_i32_0 = arith.constant 0 : i32
    %c0_i32_1 = arith.constant 0 : i32
    return %c0_i32, %c0_i32_0 : i32, i32
  }
  func.func @transform_7(%arg0: i32) -> (i32, i32) {
    %c0_i32 = arith.constant 0 : i32
    %c0_i32_0 = arith.constant 0 : i32
    return %arg0, %c0_i32 : i32, i32
  }
}

module attributes {stable_mosaic.version = 11 : i64} {
  func.func @mlp_kernel(%arg0: i32, %arg1: memref<8x128xbf16, #tpu.memory_space<vmem>>, %arg2: memref<128x128xbf16, #tpu.memory_space<vmem>>, %arg3: memref<1x128xf32, #tpu.memory_space<vmem>>, %arg4: memref<128x128xbf16, #tpu.memory_space<vmem>>, %arg5: memref<1x128xf32, #tpu.memory_space<vmem>>, %arg6: memref<128x128xbf16, #tpu.memory_space<vmem>>, %arg7: memref<1x128xf32, #tpu.memory_space<vmem>>, %arg8: memref<8x128xbf16, #tpu.memory_space<vmem>>) attributes {dimension_semantics = [#tpu.dimension_semantics<parallel>], iteration_bounds = array<i64: 1>, scalar_prefetch = 0 : i64, scratch_operands = 0 : i64, tpu.core_type = #tpu.core_type<tc>, window_params = [{transform_indices = @transform_0, window_bounds = array<i64: 8, 128>}, {pipeline_mode = #tpu.pipeline_mode<synchronous>, transform_indices = @transform_1, window_bounds = array<i64: 128, 128>}, {pipeline_mode = #tpu.pipeline_mode<synchronous>, transform_indices = @transform_2, window_bounds = array<i64: 1, 128>}, {pipeline_mode = #tpu.pipeline_mode<synchronous>, transform_indices = @transform_3, window_bounds = array<i64: 128, 128>}, {pipeline_mode = #tpu.pipeline_mode<synchronous>, transform_indices = @transform_4, window_bounds = array<i64: 1, 128>}, {pipeline_mode = #tpu.pipeline_mode<synchronous>, transform_indices = @transform_5, window_bounds = array<i64: 128, 128>}, {pipeline_mode = #tpu.pipeline_mode<synchronous>, transform_indices = @transform_6, window_bounds = array<i64: 1, 128>}, {transform_indices = @transform_7, window_bounds = array<i64: 8, 128>}]} {
    %c0 = arith.constant 0 : index
    %c0_0 = arith.constant 0 : index
    %0 = vector.load %arg1[%c0, %c0_0] : memref<8x128xbf16, #tpu.memory_space<vmem>>, vector<8x128xbf16>
    %c0_1 = arith.constant 0 : index
    %c0_2 = arith.constant 0 : index
    %1 = vector.load %arg2[%c0_1, %c0_2] : memref<128x128xbf16, #tpu.memory_space<vmem>>, vector<128x128xbf16>
    %cst = arith.constant dense<0.000000e+00> : vector<8x128xf32>
    %2 = tpu.matmul %0, %1, %cst {dimension_numbers = #tpu.dot_dimension_numbers<[1], [0], [0], [1], [0, 0, 1, 1], [], []>} : vector<8x128xbf16>, vector<128x128xbf16>, vector<8x128xf32> -> vector<8x128xf32>
    %c0_3 = arith.constant 0 : index
    %c0_4 = arith.constant 0 : index
    %3 = vector.load %arg3[%c0_3, %c0_4] : memref<1x128xf32, #tpu.memory_space<vmem>>, vector<1x128xf32>
    %4 = vector.broadcast %3 : vector<1x128xf32> to vector<8x128xf32>
    %5 = arith.addf %2, %4 : vector<8x128xf32>
    %cst_5 = arith.constant 0.000000e+00 : f32
    %6 = vector.broadcast %cst_5 : f32 to vector<8x128xf32>
    %7 = arith.maximumf %5, %6 : vector<8x128xf32>
    %8 = arith.truncf %7 : vector<8x128xf32> to vector<8x128xbf16>
    %c0_6 = arith.constant 0 : index
    %c0_7 = arith.constant 0 : index
    %9 = vector.load %arg4[%c0_6, %c0_7] : memref<128x128xbf16, #tpu.memory_space<vmem>>, vector<128x128xbf16>
    %cst_8 = arith.constant dense<0.000000e+00> : vector<8x128xf32>
    %10 = tpu.matmul %8, %9, %cst_8 {dimension_numbers = #tpu.dot_dimension_numbers<[1], [0], [0], [1], [0, 0, 1, 1], [], []>} : vector<8x128xbf16>, vector<128x128xbf16>, vector<8x128xf32> -> vector<8x128xf32>
    %c0_9 = arith.constant 0 : index
    %c0_10 = arith.constant 0 : index
    %11 = vector.load %arg5[%c0_9, %c0_10] : memref<1x128xf32, #tpu.memory_space<vmem>>, vector<1x128xf32>
    %12 = vector.broadcast %11 : vector<1x128xf32> to vector<8x128xf32>
    %13 = arith.addf %10, %12 : vector<8x128xf32>
    %cst_11 = arith.constant 0.000000e+00 : f32
    %14 = vector.broadcast %cst_11 : f32 to vector<8x128xf32>
    %15 = arith.maximumf %13, %14 : vector<8x128xf32>
    %16 = arith.truncf %15 : vector<8x128xf32> to vector<8x128xbf16>
    %c0_12 = arith.constant 0 : index
    %c0_13 = arith.constant 0 : index
    %17 = vector.load %arg6[%c0_12, %c0_13] : memref<128x128xbf16, #tpu.memory_space<vmem>>, vector<128x128xbf16>
    %cst_14 = arith.constant dense<0.000000e+00> : vector<8x128xf32>
    %18 = tpu.matmul %16, %17, %cst_14 {dimension_numbers = #tpu.dot_dimension_numbers<[1], [0], [0], [1], [0, 0, 1, 1], [], []>} : vector<8x128xbf16>, vector<128x128xbf16>, vector<8x128xf32> -> vector<8x128xf32>
    %c0_15 = arith.constant 0 : index
    %c0_16 = arith.constant 0 : index
    %19 = vector.load %arg7[%c0_15, %c0_16] : memref<1x128xf32, #tpu.memory_space<vmem>>, vector<1x128xf32>
    %20 = vector.broadcast %19 : vector<1x128xf32> to vector<8x128xf32>
    %21 = arith.addf %18, %20 : vector<8x128xf32>
    %22 = arith.truncf %21 : vector<8x128xf32> to vector<8x128xbf16>
    %c0_17 = arith.constant 0 : index
    %c0_18 = arith.constant 0 : index
    %23 = vector.load %arg8[%c0_17, %c0_18] : memref<8x128xbf16, #tpu.memory_space<vmem>>, vector<8x128xbf16>
    tpu.vector_store %arg8[%c0_17, %c0_18], %22 {strides = array<i32>} : memref<8x128xbf16, #tpu.memory_space<vmem>>, vector<8x128xbf16>,
    return
  }
  func.func @transform_0(%arg0: i32) -> (i32, i32) {
    %c0_i32 = arith.constant 0 : i32
    %c0_i32_0 = arith.constant 0 : i32
    return %arg0, %c0_i32 : i32, i32
  }
  func.func @transform_1(%arg0: i32) -> (i32, i32) {
    %c0_i32 = arith.constant 0 : i32
    %c0_i32_0 = arith.constant 0 : i32
    %c0_i32_1 = arith.constant 0 : i32
    return %c0_i32, %c0_i32_0 : i32, i32
  }
  func.func @transform_2(%arg0: i32) -> (i32, i32) {
    %c0_i32 = arith.constant 0 : i32
    %c0_i32_0 = arith.constant 0 : i32
    %c0_i32_1 = arith.constant 0 : i32
    return %c0_i32, %c0_i32_0 : i32, i32
  }
  func.func @transform_3(%arg0: i32) -> (i32, i32) {
    %c0_i32 = arith.constant 0 : i32
    %c0_i32_0 = arith.constant 0 : i32
    %c0_i32_1 = arith.constant 0 : i32
    return %c0_i32, %c0_i32_0 : i32, i32
  }
  func.func @transform_4(%arg0: i32) -> (i32, i32) {
    %c0_i32 = arith.constant 0 : i32
    %c0_i32_0 = arith.constant 0 : i32
    %c0_i32_1 = arith.constant 0 : i32
    return %c0_i32, %c0_i32_0 : i32, i32
  }
  func.func @transform_5(%arg0: i32) -> (i32, i32) {
    %c0_i32 = arith.constant 0 : i32
    %c0_i32_0 = arith.constant 0 : i32
    %c0_i32_1 = arith.constant 0 : i32
    return %c0_i32, %c0_i32_0 : i32, i32
  }
  func.func @transform_6(%arg0: i32) -> (i32, i32) {
    %c0_i32 = arith.constant 0 : i32
    %c0_i32_0 = arith.constant 0 : i32
    %c0_i32_1 = arith.constant 0 : i32
    return %c0_i32, %c0_i32_0 : i32, i32
  }
  func.func @transform_7(%arg0: i32) -> (i32, i32) {
    %c0_i32 = arith.constant 0 : i32
    %c0_i32_0 = arith.constant 0 : i32
    return %arg0, %c0_i32 : i32, i32
  }
}

</mosaic_0001>

<bundles_post_ra>
// kernel: tpu_custom_call.1
= control target key start
LH: loop header
LB: loop body
LE: loop exit
PB: predicated region body
PF: predicated region fallthrough
CT: control target
= control target key end

     0   :  { %12 = vsyncpa [#allocation3], 0  ;;  %s686_s0 = inlined_call_operand.hbm [shape: bf16[8,128], index: 0, kind: input, shape index: {}]   ;;  %s687_s1 = inlined_call_operand.hbm [shape: bf16[128,128], index: 1, kind: input, shape index: {}]   ;;  %s688_s2 = inlined_call_operand.vmem [shape: f32[1,128], index: 2, kind: input, shape index: {}]   ;;  %s689_s3 = inlined_call_operand.hbm [shape: bf16[128,128], index: 3, kind: input, shape index: {}]   ;;  %s690_s4 = inlined_call_operand.vmem [shape: f32[1,128], index: 4, kind: input, shape index: {}]   ;;  %s691_s5 = inlined_call_operand.hbm [shape: bf16[128,128], index: 5, kind: input, shape index: {}]   ;;  %s692_s6 = inlined_call_operand.vmem [shape: f32[1,128], index: 6, kind: input, shape index: {}]   ;;  %s693_s7 = inlined_call_operand.hbm [shape: bf16[8,128], index: 7, kind: output, shape index: {}]  }
   0x1   :  { %13 = vsyncpa [#allocation6], 0 }
   0x2   :  { %14 = vsyncpa [#allocation9], 0  ;;  %s31_s26 = sshll.u32 %s687_s1, 4  ;;  %s32_s26 = int_to_ptr.hbm [resolvable:$true] %s31_s26 }
   0x3   :  { %15 = vsyncpa [#allocation4], 0  ;;  %s615_s27 = smov [#allocation5]   ;;  %s21_s8 = sshll.u32 %s686_s0, 4  ;;  %s22_s8 = int_to_ptr.hbm [resolvable:$true] %s21_s8 }
   0x4   :  { %s33_s28 = sshll.u32 %s615_s27, 4  ;;  %s616_s9 = smov 64   ;;  %s34_s28 = int_to_ptr.vmem [resolvable:$true] %s33_s28 }
   0x5   :  { %s617_s10 = smov 4   ;;  %s618_s11 = smov [#allocation2]  }
   0x6   :  { %39 = dma.hbm_to_vmem [thread:$0]  %s32_s26, 1024, %s34_s28, [#allocation6], %s616_s9, %s616_s9, %s617_s10  }
   0x7   :  { %s23_s12 = sshll.u32 %s618_s11, 4  ;;  %s46_s15 = sshll.u32 %s689_s3, 4  ;;  %s24_s12 = int_to_ptr.vmem [resolvable:$true] %s23_s12  ;;  %s47_s15 = int_to_ptr.hbm [resolvable:$true] %s46_s15 }
   0x8   :  { %26 = dma.hbm_to_vmem [thread:$0]  %s22_s8, 64, %s24_s12, [#allocation3]  }
   0x9   :  { %s61_s17 = sshll.u32 %s691_s5, 4  ;;  %s619_s18 = smov [#allocation7]   ;;  %s62_s17 = int_to_ptr.hbm [resolvable:$true] %s61_s17 }
   0xa   :  { %s48_s19 = sshll.u32 %s619_s18, 4  ;;  %s620_s0 = smov [#allocation8]   ;;  %s49_s19 = int_to_ptr.vmem [resolvable:$true] %s48_s19 }
   0xb   :  { %54 = dma.hbm_to_vmem [thread:$0]  %s47_s15, 1024, %s49_s19, [#allocation6], %s616_s9, %s616_s9, %s617_s10  }
   0xc   :  { %s63_s20 = sshll.u32 %s620_s0, 4  ;;  %s64_s20 = int_to_ptr.vmem [resolvable:$true] %s63_s20 }
   0xd   :  { %69 = dma.hbm_to_vmem [thread:$0]  %s62_s17, 1024, %s64_s20, [#allocation9], %s616_s9, %s616_s9, %s617_s10  }
   0xe   :  { %607 = dma.done.wait [#allocation3], 64  }
   0xf   :  { %608 = vsyncadd [#allocation3], 4294967232 }
  0x10   :  { %609 = dma.done.wait [#allocation6], 2048  }
  0x11   :  { %610 = vsyncadd [#allocation6], 4294965248 }
  0x12   :  { %611 = dma.done.wait [#allocation9], 1024  }
  0x13   :  { %612 = vsyncadd [#allocation9], 4294966272  ;;  %v460_v0 = vld [vmem:[#allocation5 + $0x38] sm:$0xff]  ;;  %v459_v1 = vld [vmem:[#allocation5 + $0x30] sm:$0xff]  ;;  %s621_s24 = smov [#allocation10]   ;;  %s345_s28 = sshll.u32 %s693_s7, 4  ;;  %s346_s28 = int_to_ptr.hbm [resolvable:$true] %s345_s28 }
  0x14   :  { %157 = vmatpush.bf16.msra.mxu0 %v460_v0  ;;  %v468_v2 = vld [vmem:[#allocation7 + $0x38] sm:$0xff]  ;;  %v467_v3 = vld [vmem:[#allocation7 + $0x30] sm:$0xff]  ;;  %v458_v4 = vld [vmem:[#allocation5 + $0x28] sm:$0xff]  ;;  %s343_s25 = sshll.u32 %s621_s24, 4  ;;  %s344_s25 = int_to_ptr.vmem [resolvable:$true] %s343_s25 }
  0x15   :  { %240 = vmatpush.bf16.msra.mxu1 %v468_v2  ;;  %v466_v5 = vld [vmem:[#allocation7 + $0x28] sm:$0xff]  ;;  %v457_v6 = vld [vmem:[#allocation5 + $0x20] sm:$0xff]  ;;  %v456_v8 = vld [vmem:[#allocation5 + $0x18] sm:$0xff] }
  0x16   :  { %v465_v7 = vld [vmem:[#allocation7 + $0x20] sm:$0xff]  ;;  %v464_v9 = vld [vmem:[#allocation7 + $0x18] sm:$0xff]  ;;  %v455_v10 = vld [vmem:[#allocation5 + $0x10] sm:$0xff] }
  0x17   :  { %v463_v11 = vld [vmem:[#allocation7 + $0x10] sm:$0xff]  ;;  %v454_v12 = vld [vmem:[#allocation5 + $0x8] sm:$0xff]  ;;  %v453_v13 = vld [vmem:[#allocation5] sm:$0xff] }
  0x18   :  { %158 = vmatpush.bf16.msra.mxu0 %v459_v1  ;;  %v88_v14 = vld [vmem:[#allocation2] sm:$0xf]  ;;  %v462_v15 = vld [vmem:[#allocation7 + $0x8] sm:$0xff]  ;;  %v461_v16 = vld [vmem:[#allocation7] sm:$0xff] }
  0x19   :  { %241 = vmatpush.bf16.msra.mxu1 %v467_v3  ;;  %v476_v17 = vld [vmem:[#allocation8 + $0x38] sm:$0xff]  ;;  %v475_v18 = vld [vmem:[#allocation8 + $0x30] sm:$0xff]  ;;  %v474_v19 = vld [vmem:[#allocation8 + $0x28] sm:$0xff] }
  0x1a   :  { %323 = vmatpush.bf16.msra.mxu2 %v476_v17  ;;  %v473_v20 = vld [vmem:[#allocation8 + $0x20] sm:$0xff]  ;;  %v472_v21 = vld [vmem:[#allocation8 + $0x18] sm:$0xff]  ;;  %v471_v22 = vld [vmem:[#allocation8 + $0x10] sm:$0xff] }
  0x1b   :  { %v484_v23 = vld [vmem:[%s688_s2] ss:$0 sm:$0xff]  ;;  %v470_v29 = vld [vmem:[#allocation8 + $0x8] sm:$0xff]  ;;  %v469_v30 = vld [vmem:[#allocation8] sm:$0xff] }
  0x1c   :  { %159 = vmatpush.bf16.msra.mxu0 %v458_v4  ;;  %v485_v31 = vld [vmem:[%s690_s4] ss:$0 sm:$0xff] }
  0x1d   :  { %242 = vmatpush.bf16.msra.mxu1 %v466_v5  ;;  %v486_v37 = vld [vmem:[%s692_s6] ss:$0 sm:$0xff] }
  0x1e   :  { %324 = vmatpush.bf16.msra.mxu2 %v475_v18 }
  0x20   :  { %160 = vmatpush.bf16.msra.mxu0 %v457_v6 }
  0x21   :  { %243 = vmatpush.bf16.msra.mxu1 %v465_v7 }
  0x22   :  { %325 = vmatpush.bf16.msra.mxu2 %v474_v19 }
  0x24   :  { %161 = vmatpush.bf16.msra.mxu0 %v456_v8 }
  0x25   :  { %244 = vmatpush.bf16.msra.mxu1 %v464_v9 }
  0x26   :  { %326 = vmatpush.bf16.msra.mxu2 %v473_v20 }
  0x28   :  { %162 = vmatpush.bf16.msra.mxu0 %v455_v10 }
  0x29   :  { %245 = vmatpush.bf16.msra.mxu1 %v463_v11 }
  0x2a   :  { %327 = vmatpush.bf16.msra.mxu2 %v472_v21 }
  0x2c   :  { %163 = vmatpush.bf16.msra.mxu0 %v454_v12 }
  0x2d   :  { %246 = vmatpush.bf16.msra.mxu1 %v462_v15 }
  0x2e   :  { %328 = vmatpush.bf16.msra.mxu2 %v471_v22 }
  0x30   :  { %164 = vmatpush.bf16.msra.mxu0 %v453_v13 }
  0x31   :  { %247 = vmatpush.bf16.msra.mxu1 %v461_v16 }
  0x32   :  { %329 = vmatpush.bf16.msra.mxu2 %v470_v29 }
  0x33   :  { %165 = vmatmul.bf16.vlgmr.msra.gmra.mxu0 %v88_v14 }
  0x36   :  { %330 = vmatpush.bf16.msra.mxu2 %v469_v30 }
  0xb0   :  { %v166_v24 = vpop.f32.mrf.mxu0 }
  0xb1   :  { %v167_v25 = vadd.f32 %v484_v23, %v166_v24 }
  0xb3   :  { %v170_v26 = vmax.f32 %v167_v25, 0.0 }
  0xb5   :  { %v171_v27 = vpack.c.bf16 %v170_v26, %v170_v26 }
  0xb7   :  { %248 = vmatmul.bf16.vlgmr.msra.gmra.mxu1 %v171_v27 }
  0xb8   :  { %v168_v28 = vpop.f32.mrf.mxu0 }
 0x134   :  { %v249_v32 = vpop.f32.mrf.mxu1 }
 0x135   :  { %v250_v33 = vadd.f32 %v485_v31, %v249_v32 }
 0x137   :  { %v253_v34 = vmax.f32 %v250_v33, 0.0 }
 0x139   :  { %v254_v35 = vpack.c.bf16 %v253_v34, %v253_v34 }
 0x13b   :  { %331 = vmatmul.bf16.vlgmr.msra.gmra.mxu2 %v254_v35 }
 0x13c   :  { %v251_v36 = vpop.f32.mrf.mxu1 }
 0x1be   :  { %v332_v38 = vpop.f32.mrf.mxu2 }
 0x1bf   :  { %v333_v39 = vadd.f32 %v486_v37, %v332_v38 }
 0x1c1   :  { %v336_v40 = vpack.c.bf16 %v333_v39, %v333_v39 }
 0x1c3   :  { %337 = vst [vmem:[#allocation10] sm:$0xf] %v336_v40 }
 0x1c4   :  { %348 = dma.vmem_to_hbm [thread:$0]  %s344_s25, 64, %s346_s28, [#allocation4]  }
 0x1c6   :  { %v334_v41 = vpop.f32.mrf.mxu2 }
 0x1c7   :  { %613 = dma.done.wait [#allocation4], 64  }
 0x1c8   :  { %614 = vsyncadd [#allocation4], 4294967232 }
 0x1c9   :  { %353 = vsyncpa [#allocation3], 1 }
 0x1ca   :  { %354 = vsyncpa [#allocation6], 1 }
 0x1cb   :  { %355 = vsyncpa [#allocation9], 1 }
 0x1cc   :  { %356 = vsyncpa [#allocation4], 1 }

// kernel: tpu_custom_call.1
= control target key start
LH: loop header
LB: loop body
LE: loop exit
PB: predicated region body
PF: predicated region fallthrough
CT: control target
= control target key end

     0   :  { %12 = vsyncpa [#allocation3], 0  ;;  %s686_s0 = inlined_call_operand.hbm [shape: bf16[8,128], index: 0, kind: input, shape index: {}]   ;;  %s687_s1 = inlined_call_operand.hbm [shape: bf16[128,128], index: 1, kind: input, shape index: {}]   ;;  %s688_s2 = inlined_call_operand.vmem [shape: f32[1,128], index: 2, kind: input, shape index: {}]   ;;  %s689_s3 = inlined_call_operand.hbm [shape: bf16[128,128], index: 3, kind: input, shape index: {}]   ;;  %s690_s4 = inlined_call_operand.vmem [shape: f32[1,128], index: 4, kind: input, shape index: {}]   ;;  %s691_s5 = inlined_call_operand.hbm [shape: bf16[128,128], index: 5, kind: input, shape index: {}]   ;;  %s692_s6 = inlined_call_operand.vmem [shape: f32[1,128], index: 6, kind: input, shape index: {}]   ;;  %s693_s7 = inlined_call_operand.hbm [shape: bf16[8,128], index: 7, kind: output, shape index: {}]  }
   0x1   :  { %13 = vsyncpa [#allocation6], 0 }
   0x2   :  { %14 = vsyncpa [#allocation9], 0  ;;  %s31_s26 = sshll.u32 %s687_s1, 4  ;;  %s32_s26 = int_to_ptr.hbm [resolvable:$true] %s31_s26 }
   0x3   :  { %15 = vsyncpa [#allocation4], 0  ;;  %s615_s27 = smov [#allocation5]   ;;  %s21_s8 = sshll.u32 %s686_s0, 4  ;;  %s22_s8 = int_to_ptr.hbm [resolvable:$true] %s21_s8 }
   0x4   :  { %s33_s28 = sshll.u32 %s615_s27, 4  ;;  %s616_s9 = smov 64   ;;  %s34_s28 = int_to_ptr.vmem [resolvable:$true] %s33_s28 }
   0x5   :  { %s617_s10 = smov 4   ;;  %s618_s11 = smov [#allocation2]  }
   0x6   :  { %39 = dma.hbm_to_vmem [thread:$0]  %s32_s26, 1024, %s34_s28, [#allocation6], %s616_s9, %s616_s9, %s617_s10  }
   0x7   :  { %s23_s12 = sshll.u32 %s618_s11, 4  ;;  %s46_s15 = sshll.u32 %s689_s3, 4  ;;  %s24_s12 = int_to_ptr.vmem [resolvable:$true] %s23_s12  ;;  %s47_s15 = int_to_ptr.hbm [resolvable:$true] %s46_s15 }
   0x8   :  { %26 = dma.hbm_to_vmem [thread:$0]  %s22_s8, 64, %s24_s12, [#allocation3]  }
   0x9   :  { %s61_s17 = sshll.u32 %s691_s5, 4  ;;  %s619_s18 = smov [#allocation7]   ;;  %s62_s17 = int_to_ptr.hbm [resolvable:$true] %s61_s17 }
   0xa   :  { %s48_s19 = sshll.u32 %s619_s18, 4  ;;  %s620_s0 = smov [#allocation8]   ;;  %s49_s19 = int_to_ptr.vmem [resolvable:$true] %s48_s19 }
   0xb   :  { %54 = dma.hbm_to_vmem [thread:$0]  %s47_s15, 1024, %s49_s19, [#allocation6], %s616_s9, %s616_s9, %s617_s10  }
   0xc   :  { %s63_s20 = sshll.u32 %s620_s0, 4  ;;  %s64_s20 = int_to_ptr.vmem [resolvable:$true] %s63_s20 }
   0xd   :  { %69 = dma.hbm_to_vmem [thread:$0]  %s62_s17, 1024, %s64_s20, [#allocation9], %s616_s9, %s616_s9, %s617_s10  }
   0xe   :  { %607 = dma.done.wait [#allocation3], 64  }
   0xf   :  { %608 = vsyncadd [#allocation3], 4294967232 }
  0x10   :  { %609 = dma.done.wait [#allocation6], 2048  }
  0x11   :  { %610 = vsyncadd [#allocation6], 4294965248 }
  0x12   :  { %611 = dma.done.wait [#allocation9], 1024  }
  0x13   :  { %612 = vsyncadd [#allocation9], 4294966272  ;;  %v460_v0 = vld [vmem:[#allocation5 + $0x38] sm:$0xff]  ;;  %v459_v1 = vld [vmem:[#allocation5 + $0x30] sm:$0xff]  ;;  %s621_s24 = smov [#allocation10]   ;;  %s345_s28 = sshll.u32 %s693_s7, 4  ;;  %s346_s28 = int_to_ptr.hbm [resolvable:$true] %s345_s28 }
  0x14   :  { %157 = vmatpush.bf16.msra.mxu0 %v460_v0  ;;  %v468_v2 = vld [vmem:[#allocation7 + $0x38] sm:$0xff]  ;;  %v467_v3 = vld [vmem:[#allocation7 + $0x30] sm:$0xff]  ;;  %v458_v4 = vld [vmem:[#allocation5 + $0x28] sm:$0xff]  ;;  %s343_s25 = sshll.u32 %s621_s24, 4  ;;  %s344_s25 = int_to_ptr.vmem [resolvable:$true] %s343_s25 }
  0x15   :  { %240 = vmatpush.bf16.msra.mxu1 %v468_v2  ;;  %v466_v5 = vld [vmem:[#allocation7 + $0x28] sm:$0xff]  ;;  %v457_v6 = vld [vmem:[#allocation5 + $0x20] sm:$0xff]  ;;  %v456_v8 = vld [vmem:[#allocation5 + $0x18] sm:$0xff] }
  0x16   :  { %v465_v7 = vld [vmem:[#allocation7 + $0x20] sm:$0xff]  ;;  %v464_v9 = vld [vmem:[#allocation7 + $0x18] sm:$0xff]  ;;  %v455_v10 = vld [vmem:[#allocation5 + $0x10] sm:$0xff] }
  0x17   :  { %v463_v11 = vld [vmem:[#allocation7 + $0x10] sm:$0xff]  ;;  %v454_v12 = vld [vmem:[#allocation5 + $0x8] sm:$0xff]  ;;  %v453_v13 = vld [vmem:[#allocation5] sm:$0xff] }
  0x18   :  { %158 = vmatpush.bf16.msra.mxu0 %v459_v1  ;;  %v88_v14 = vld [vmem:[#allocation2] sm:$0xf]  ;;  %v462_v15 = vld [vmem:[#allocation7 + $0x8] sm:$0xff]  ;;  %v461_v16 = vld [vmem:[#allocation7] sm:$0xff] }
  0x19   :  { %241 = vmatpush.bf16.msra.mxu1 %v467_v3  ;;  %v476_v17 = vld [vmem:[#allocation8 + $0x38] sm:$0xff]  ;;  %v475_v18 = vld [vmem:[#allocation8 + $0x30] sm:$0xff]  ;;  %v474_v19 = vld [vmem:[#allocation8 + $0x28] sm:$0xff] }
  0x1a   :  { %323 = vmatpush.bf16.msra.mxu2 %v476_v17  ;;  %v473_v20 = vld [vmem:[#allocation8 + $0x20] sm:$0xff]  ;;  %v472_v21 = vld [vmem:[#allocation8 + $0x18] sm:$0xff]  ;;  %v471_v22 = vld [vmem:[#allocation8 + $0x10] sm:$0xff] }
  0x1b   :  { %v484_v23 = vld [vmem:[%s688_s2] ss:$0 sm:$0xff]  ;;  %v470_v29 = vld [vmem:[#allocation8 + $0x8] sm:$0xff]  ;;  %v469_v30 = vld [vmem:[#allocation8] sm:$0xff] }
  0x1c   :  { %159 = vmatpush.bf16.msra.mxu0 %v458_v4  ;;  %v485_v31 = vld [vmem:[%s690_s4] ss:$0 sm:$0xff] }
  0x1d   :  { %242 = vmatpush.bf16.msra.mxu1 %v466_v5  ;;  %v486_v37 = vld [vmem:[%s692_s6] ss:$0 sm:$0xff] }
  0x1e   :  { %324 = vmatpush.bf16.msra.mxu2 %v475_v18 }
  0x20   :  { %160 = vmatpush.bf16.msra.mxu0 %v457_v6 }
  0x21   :  { %243 = vmatpush.bf16.msra.mxu1 %v465_v7 }
  0x22   :  { %325 = vmatpush.bf16.msra.mxu2 %v474_v19 }
  0x24   :  { %161 = vmatpush.bf16.msra.mxu0 %v456_v8 }
  0x25   :  { %244 = vmatpush.bf16.msra.mxu1 %v464_v9 }
  0x26   :  { %326 = vmatpush.bf16.msra.mxu2 %v473_v20 }
  0x28   :  { %162 = vmatpush.bf16.msra.mxu0 %v455_v10 }
  0x29   :  { %245 = vmatpush.bf16.msra.mxu1 %v463_v11 }
  0x2a   :  { %327 = vmatpush.bf16.msra.mxu2 %v472_v21 }
  0x2c   :  { %163 = vmatpush.bf16.msra.mxu0 %v454_v12 }
  0x2d   :  { %246 = vmatpush.bf16.msra.mxu1 %v462_v15 }
  0x2e   :  { %328 = vmatpush.bf16.msra.mxu2 %v471_v22 }
  0x30   :  { %164 = vmatpush.bf16.msra.mxu0 %v453_v13 }
  0x31   :  { %247 = vmatpush.bf16.msra.mxu1 %v461_v16 }
  0x32   :  { %329 = vmatpush.bf16.msra.mxu2 %v470_v29 }
  0x33   :  { %165 = vmatmul.bf16.vlgmr.msra.gmra.mxu0 %v88_v14 }
  0x36   :  { %330 = vmatpush.bf16.msra.mxu2 %v469_v30 }
  0xb0   :  { %v166_v24 = vpop.f32.mrf.mxu0 }
  0xb1   :  { %v167_v25 = vadd.f32 %v484_v23, %v166_v24 }
  0xb3   :  { %v170_v26 = vmax.f32 %v167_v25, 0.0 }
  0xb5   :  { %v171_v27 = vpack.c.bf16 %v170_v26, %v170_v26 }
  0xb7   :  { %248 = vmatmul.bf16.vlgmr.msra.gmra.mxu1 %v171_v27 }
  0xb8   :  { %v168_v28 = vpop.f32.mrf.mxu0 }
 0x134   :  { %v249_v32 = vpop.f32.mrf.mxu1 }
 0x135   :  { %v250_v33 = vadd.f32 %v485_v31, %v249_v32 }
 0x137   :  { %v253_v34 = vmax.f32 %v250_v33, 0.0 }
 0x139   :  { %v254_v35 = vpack.c.bf16 %v253_v34, %v253_v34 }
 0x13b   :  { %331 = vmatmul.bf16.vlgmr.msra.gmra.mxu2 %v254_v35 }
 0x13c   :  { %v251_v36 = vpop.f32.mrf.mxu1 }
 0x1be   :  { %v332_v38 = vpop.f32.mrf.mxu2 }
 0x1bf   :  { %v333_v39 = vadd.f32 %v486_v37, %v332_v38 }
 0x1c1   :  { %v336_v40 = vpack.c.bf16 %v333_v39, %v333_v39 }
 0x1c3   :  { %337 = vst [vmem:[#allocation10] sm:$0xf] %v336_v40 }
 0x1c4   :  { %348 = dma.vmem_to_hbm [thread:$0]  %s344_s25, 64, %s346_s28, [#allocation4]  }
 0x1c6   :  { %v334_v41 = vpop.f32.mrf.mxu2 }
 0x1c7   :  { %613 = dma.done.wait [#allocation4], 64  }
 0x1c8   :  { %614 = vsyncadd [#allocation4], 4294967232 }
 0x1c9   :  { %353 = vsyncpa [#allocation3], 1 }
 0x1ca   :  { %354 = vsyncpa [#allocation6], 1 }
 0x1cb   :  { %355 = vsyncpa [#allocation9], 1 }
 0x1cc   :  { %356 = vsyncpa [#allocation4], 1 }

</bundles_post_ra>
